<compile_context>
chip_gen: v7x
topology: tpu7x:2x2x1
jax: 0.10.0
libtpu: 0.0.40
codegen_flags: <defaults>
</compile_context>

<pallas_src>
import functools
import math

import jax
import jax.numpy as jnp
from jax.experimental import pallas as pl
from jax.experimental.pallas import tpu as pltpu


# ----------------------------------------------------------------------------
# Tiled linear (GEMM + bias) kernel
# ----------------------------------------------------------------------------
def _linear_kernel(x_ref, w_ref, b_ref, o_ref, acc_ref, *, compute_dtype):
    # x: [tm, tk], w: [tk, tn], b: [1, tn], o: [tm, tn], acc: [tm, tn] f32
    @pl.when(pl.program_id(2) == 0)
    def _():
        acc_ref[...] = jnp.zeros_like(acc_ref)

    acc_ref[...] += jnp.dot(
        x_ref[...].astype(compute_dtype),
        w_ref[...].astype(compute_dtype),
        preferred_element_type=jnp.float32,
    )

    @pl.when(pl.program_id(2) == pl.num_programs(2) - 1)
    def _():
        o_ref[...] = (acc_ref[...] + b_ref[...].astype(jnp.float32)).astype(o_ref.dtype)


def _tile_and_pad(dim, tile):
    """Full-dim block for small dims, otherwise a (tile, padded-dim) pair."""
    if dim <= tile:
        return dim, dim
    padded = dim + ((-dim) % tile)
    return tile, padded


def pallas_linear(x2d, w, b, *, out_dtype=None, compute_dtype=jnp.bfloat16,
                  tm=256, tn=256, tk=512):
    """x2d: [N, Din] @ w: [Din, Dout] + b: [Dout] -> [N, Dout] (tiled GEMM)."""
    N, Din = x2d.shape
    Dout = w.shape[1]
    out_dtype = out_dtype if out_dtype is not None else x2d.dtype

    tm_, Np = _tile_and_pad(N, tm)
    tn_, Doutp = _tile_and_pad(Dout, tn)
    tk_, Dinp = _tile_and_pad(Din, tk)

    xp = x2d
    if Np != N or Dinp != Din:
        xp = jnp.pad(x2d, ((0, Np - N), (0, Dinp - Din)))
    wp = w
    if Dinp != Din or Doutp != Dout:
        wp = jnp.pad(w, ((0, Dinp - Din), (0, Doutp - Dout)))
    bp = b.reshape(1, Dout)
    if Doutp != Dout:
        bp = jnp.pad(bp, ((0, 0), (0, Doutp - Dout)))

    grid = (Np // tm_, Doutp // tn_, Dinp // tk_)

    out = pl.pallas_call(
        functools.partial(_linear_kernel, compute_dtype=compute_dtype),
        out_shape=jax.ShapeDtypeStruct((Np, Doutp), out_dtype),
        grid=grid,
        in_specs=[
            pl.BlockSpec((tm_, tk_), lambda i, j, k: (i, k)),
            pl.BlockSpec((tk_, tn_), lambda i, j, k: (k, j)),
            pl.BlockSpec((1, tn_), lambda i, j, k: (0, j)),
        ],
        out_specs=pl.BlockSpec((tm_, tn_), lambda i, j, k: (i, j)),
        scratch_shapes=[pltpu.VMEM((tm_, tn_), jnp.float32)],
        compiler_params=pltpu.CompilerParams(
            dimension_semantics=("parallel", "parallel", "arbitrary"),
            # per-step footprint with tm=tn=256, tk=512 is ~3 MiB (<< limit),
            # safe on v5e/v6e (128 MiB) and v7x (64 MiB) alike.
            vmem_limit_bytes=32 * 1024 * 1024,
        ),
    )(xp, wp, bp)

    if Np != N or Doutp != Dout:
        out = out[:N, :Dout]
    return out


# ----------------------------------------------------------------------------
# Attention kernel (per (batch, head-group, q-block) tile)
# ----------------------------------------------------------------------------
def _attention_kernel(q_ref, k_ref, v_ref, mask_ref, o_ref, *,
                      heads_per_block, dim_per_head, compute_dtype,
                      apply_mask, approx_recip):
    # q_ref: [bq, hg*D]  k_ref/v_ref: [Lk, hg*D]
    # mask_ref: [1 or bq, Lk] (nonzero = masked)   o_ref: [bq, hg*D]
    scale = 1.0 / math.sqrt(dim_per_head)

    q_all = q_ref[...].astype(jnp.float32) * scale        # scale in f32
    k_all = k_ref[...]
    v_all = v_ref[...]
    if apply_mask:
        masked = mask_ref[...] != 0                        # [mq, Lk] bool

    ctx_heads = []
    for h in range(heads_per_block):
        sl = slice(h * dim_per_head, (h + 1) * dim_per_head)
        q = q_all[:, sl].astype(compute_dtype)             # [bq, D]
        k = k_all[:, sl].astype(compute_dtype)             # [Lk, D]
        # scores = q @ k^T without materializing a transpose: contract the
        # feature axis of both operands directly on the MXU (f32 accumulate).
        scores = jax.lax.dot_general(
            q, k,
            dimension_numbers=(((1,), (1,)), ((), ())),
            preferred_element_type=jnp.float32,
        )                                                  # [bq, Lk]
        if apply_mask:
            scores = jnp.where(masked, jnp.float32(-1e18), scores)
        # softmax over keys (matches torch.nn.Softmax(dim=-1))
        m = jnp.max(scores, axis=-1, keepdims=True)
        e = jnp.exp(scores - m)
        denom = jnp.sum(e, axis=-1, keepdims=True)
        attn = e * pl.reciprocal(denom, approx=approx_recip)
        ctx = jnp.dot(attn.astype(compute_dtype),
                      v_all[:, sl].astype(compute_dtype),
                      preferred_element_type=jnp.float32)  # [bq, D]
        ctx_heads.append(ctx)

    out = ctx_heads[0] if heads_per_block == 1 else jnp.concatenate(ctx_heads, axis=-1)
    o_ref[...] = out.astype(o_ref.dtype)


def _pick_head_group(head_count, dim_per_head, lane_target=512):
    """Heads per grid step: lane-dense (multiple of 128) or the full width."""
    if head_count * dim_per_head <= lane_target:
        return head_count
    for hg in range(head_count, 0, -1):
        w = hg * dim_per_head
        if head_count % hg == 0 and w % 128 == 0 and w <= lane_target:
            return hg
    return head_count  # full feature width is always layout-legal


def _pick_q_block(query_len, target=256):
    if query_len <= target:
        return query_len
    for bq in (target, 128, 64, 32, 16, 8):
        if query_len % bq == 0:
            return bq
    return query_len  # odd length: single (full) block, always layout-legal


def pallas_attention(q_src, k_src, v_src, mask, *, head_count, dim_per_head,
                     out_dtype=None, compute_dtype=jnp.bfloat16,
                     q_block_target=256, lane_target=512):
    """Scaled-dot-product attention over [B, L, H*D] activations.

    q_src/k_src/v_src are (array, feature_offset) pairs so that Q/K/V may live
    inside a single fused projection buffer without any HBM transpose/split.
    mask is None, [B, 1, Lk] (key padding) or [B, Lq, Lk]; nonzero = masked.
    Returns the merged-head context [B, Lq, H*D].
    """
    q_arr, q_off = q_src
    k_arr, k_off = k_src
    v_arr, v_off = v_src
    B, Lq = q_arr.shape[0], q_arr.shape[1]
    Lk = k_arr.shape[1]
    Dm = head_count * dim_per_head
    out_dtype = out_dtype if out_dtype is not None else q_arr.dtype

    hg = _pick_head_group(head_count, dim_per_head, lane_target)
    hgD = hg * dim_per_head
    nhb = head_count // hg
    bq = _pick_q_block(Lq, q_block_target)
    nqb = Lq // bq

    def _normalize(arr, feat_off):
        # Zero-copy head-block indexing into a (possibly fused) buffer when the
        # hgD-wide lane block is layout-legal; otherwise materialize the Dm
        # slice (still far cheaper than the old [B,H,L,D] transposes).
        if hgD % 128 == 0 or (arr.shape[-1] == hgD and feat_off == 0):
            return arr, feat_off // hgD
        return arr[..., feat_off:feat_off + Dm], 0

    q_arr, q_bo = _normalize(q_arr, q_off)
    k_arr, k_bo = _normalize(k_arr, k_off)
    v_arr, v_bo = _normalize(v_arr, v_off)

    sq = pl.Squeezed()

    if mask is None:
        mask_arr = jnp.zeros((B, 1, Lk), dtype=jnp.int32)
        mask_spec = pl.BlockSpec((sq, 1, Lk), lambda b, hi, qi: (b, 0, 0))
        apply_mask = False
    elif mask.shape[1] == 1:
        # key-padding mask: tiny [B, 1, Lk] int32, broadcast over Lq in-kernel.
        mask_arr = mask.astype(jnp.int32)
        mask_spec = pl.BlockSpec((sq, 1, Lk), lambda b, hi, qi: (b, 0, 0))
        apply_mask = True
    else:
        # full [B, Lq, Lk] mask, tiled over the q axis (int32 keeps the
        # 8-sublane block rule trivially satisfied for any bq).
        mask_arr = mask.astype(jnp.int32)
        mask_spec = pl.BlockSpec((sq, bq, Lk), lambda b, hi, qi: (b, qi, 0))
        apply_mask = True

    kernel = functools.partial(
        _attention_kernel,
        heads_per_block=hg,
        dim_per_head=dim_per_head,
        compute_dtype=compute_dtype,
        apply_mask=apply_mask,
        # exact reciprocal only on the full-precision validation path
        approx_recip=(compute_dtype != jnp.float32),
    )

    # grid: (batch, head-group, q-block); q-block innermost so the K/V blocks
    # (which only depend on b, hi) stay resident across q iterations.
    return pl.pallas_call(
        kernel,
        out_shape=jax.ShapeDtypeStruct((B, Lq, Dm), out_dtype),
        grid=(B, nhb, nqb),
        in_specs=[
            pl.BlockSpec((sq, bq, hgD), lambda b, hi, qi: (b, qi, q_bo + hi)),
            pl.BlockSpec((sq, Lk, hgD), lambda b, hi, qi: (b, 0, k_bo + hi)),
            pl.BlockSpec((sq, Lk, hgD), lambda b, hi, qi: (b, 0, v_bo + hi)),
            mask_spec,
        ],
        out_specs=pl.BlockSpec((sq, bq, hgD), lambda b, hi, qi: (b, qi, hi)),
        compiler_params=pltpu.CompilerParams(
            dimension_semantics=("parallel", "parallel", "parallel"),
            vmem_limit_bytes=32 * 1024 * 1024,
        ),
    )(q_arr, k_arr, v_arr, mask_arr)


# ----------------------------------------------------------------------------
# Module-level forward
# ----------------------------------------------------------------------------
def multi_headed_attention_forward(params, key, value, query, mask=None,
                                   compute_dtype=jnp.bfloat16):
    """
    key/value: [B, key_len, model_dim], query: [B, query_len, model_dim]
    mask: optional bool/int [B, 1, key_len] or [B, query_len, key_len]
          (nonzero/True = masked out).
    Returns output [B, query_len, model_dim].
    """
    H = params["head_count"]
    Dm = params["model_dim"]
    D = Dm // H
    B, Lk, _ = key.shape
    Lq = query.shape[1]

    Wq, bq_ = params["Wq"], params["bq"]
    Wk, bk_ = params["Wk"], params["bk"]
    Wv, bv_ = params["Wv"], params["bv"]

    if (query is key) and (key is value):
        # self-attention: single fused QKV GEMM (activation read once).
        Wqkv = jnp.concatenate([Wq, Wk, Wv], axis=1)
        bqkv = jnp.concatenate([bq_, bk_, bv_], axis=0)
        fused = pallas_linear(query.reshape(B * Lq, Dm), Wqkv, bqkv,
                              compute_dtype=compute_dtype).reshape(B, Lq, 3 * Dm)
        q_src, k_src, v_src = (fused, 0), (fused, Dm), (fused, 2 * Dm)
    elif key is value:
        # cross-attention over a shared memory bank: fuse the K/V GEMM.
        Wkv = jnp.concatenate([Wk, Wv], axis=1)
        bkv = jnp.concatenate([bk_, bv_], axis=0)
        kv = pallas_linear(key.reshape(B * Lk, Dm), Wkv, bkv,
                           compute_dtype=compute_dtype).reshape(B, Lk, 2 * Dm)
        qp = pallas_linear(query.reshape(B * Lq, Dm), Wq, bq_,
                           compute_dtype=compute_dtype).reshape(B, Lq, Dm)
        q_src, k_src, v_src = (qp, 0), (kv, 0), (kv, Dm)
    else:
        kp = pallas_linear(key.reshape(B * Lk, Dm), Wk, bk_,
                           compute_dtype=compute_dtype).reshape(B, Lk, Dm)
        vp = pallas_linear(value.reshape(B * Lk, Dm), Wv, bv_,
                           compute_dtype=compute_dtype).reshape(B, Lk, Dm)
        qp = pallas_linear(query.reshape(B * Lq, Dm), Wq, bq_,
                           compute_dtype=compute_dtype).reshape(B, Lq, Dm)
        q_src, k_src, v_src = (qp, 0), (kp, 0), (vp, 0)

    # context comes back as [B, Lq, H*D] -> only a free reshape before Wf.
    ctx = pallas_attention(q_src, k_src, v_src, mask,
                           head_count=H, dim_per_head=D,
                           compute_dtype=compute_dtype)

    out = pallas_linear(ctx.reshape(B * Lq, Dm), params["Wf"], params["bf"],
                        compute_dtype=compute_dtype)
    return out.reshape(B, Lq, Dm)


# ----------------------------------------------------------------------------
# Deterministic parameter init (same shapes as the PyTorch module)
# ----------------------------------------------------------------------------
def init_params(key, head_count, model_dim):
    ks = jax.random.split(key, 8)
    bound = 1.0 / math.sqrt(model_dim)

    def u(k, shape):
        return jax.random.uniform(k, shape, jnp.float32, -bound, bound)

    # Stored as [in, out] (transpose of PyTorch's nn.Linear weight layout).
    return {
        "head_count": head_count,
        "model_dim": model_dim,
        "Wk": u(ks[0], (model_dim, model_dim)), "bk": u(ks[1], (model_dim,)),
        "Wv": u(ks[2], (model_dim, model_dim)), "bv": u(ks[3], (model_dim,)),
        "Wq": u(ks[4], (model_dim, model_dim)), "bq": u(ks[5], (model_dim,)),
        "Wf": u(ks[6], (model_dim, model_dim)), "bf": u(ks[7], (model_dim,)),
    }


# ----------------------------------------------------------------------------
# Pure-JAX reference for correctness checking
# ----------------------------------------------------------------------------
def reference_forward(params, key, value, query, mask=None):
    H = params["head_count"]
    Dm = params["model_dim"]
    D = Dm // H
    B, Lk, _ = key.shape
    Lq = query.shape[1]

    k = key @ params["Wk"] + params["bk"]
    v = value @ params["Wv"] + params["bv"]
    q = query @ params["Wq"] + params["bq"]

    def sh(x, L):
        return x.reshape(B, L, H, D).transpose(0, 2, 1, 3)

    q, k, v = sh(q, Lq), sh(k, Lk), sh(v, Lk)
    q = q / math.sqrt(D)
    scores = jnp.einsum("bhqd,bhkd->bhqk", q, k)
    if mask is not None:
        scores = jnp.where(mask[:, None, :, :] != 0, -1e18, scores)
    attn = jax.nn.softmax(scores, axis=-1)
    ctx = jnp.einsum("bhqk,bhkd->bhqd", attn, v)
    ctx = ctx.transpose(0, 2, 1, 3).reshape(B, Lq, Dm)
    return ctx @ params["Wf"] + params["bf"]


# ----------------------------------------------------------------------------
if __name__ == "__main__":
    B, head_count, model_dim = 2, 4, 32
    seq_len = 8             # self-attention sequence length
    mem_len, q_len = 16, 8  # cross-attention lengths

    root = jax.random.PRNGKey(0)
    kp, kx, km, kq = jax.random.split(root, 4)
    params = init_params(kp, head_count, model_dim)

    # --- case 1: self-attention (fused QKV GEMM) with a key-padding mask ----
    x = jax.random.normal(kx, (B, seq_len, model_dim), jnp.float32)
    key_pad = jnp.array([[False] * seq_len,
                         [False] * (seq_len - 2) + [True] * 2])
    pad_mask = key_pad[:, None, :]                      # [B, 1, Lk]

    out_bf16 = multi_headed_attention_forward(params, x, x, x, pad_mask)
    out_f32 = multi_headed_attention_forward(params, x, x, x, pad_mask,
                                             compute_dtype=jnp.float32)
    out_bf16, out_f32 = jax.block_until_ready((out_bf16, out_f32))

    ref1 = reference_forward(params, x, x, x, pad_mask)
    assert out_f32.shape == (B, seq_len, model_dim)
    assert jnp.allclose(out_f32, ref1, atol=1e-4, rtol=1e-4), \
        "f32 self-attention mismatch vs reference"
    assert jnp.allclose(out_bf16, ref1, atol=5e-2, rtol=5e-2), \
        "bf16-MXU self-attention mismatch vs reference"

    # --- case 2: cross-attention (fused KV GEMM) with a full [B,Lq,Lk] mask --
    mem = jax.random.normal(km, (B, mem_len, model_dim), jnp.float32)
    qry = jax.random.normal(kq, (B, q_len, model_dim), jnp.float32)
    full_mask = jax.random.bernoulli(jax.random.PRNGKey(7), 0.25,
                                     (B, q_len, mem_len))
    out2 = multi_headed_attention_forward(params, mem, mem, qry, full_mask,
                                          compute_dtype=jnp.float32)
    out2 = jax.block_until_ready(out2)
    ref2 = reference_forward(params, mem, mem, qry, full_mask)
    assert out2.shape == (B, q_len, model_dim)
    assert jnp.allclose(out2, ref2, atol=1e-4, rtol=1e-4), \
        "f32 cross-attention mismatch vs reference"

    print("KERNEL_OK")
</pallas_src>

<mosaic_0001>
module attributes {stable_mosaic.version = 11 : i64} {
  func.func @_linear_kernel(%arg0: i32, %arg1: i32, %arg2: i32, %arg3: memref<16x32xf32, #tpu.memory_space<vmem>>, %arg4: memref<32x96xf32, #tpu.memory_space<vmem>>, %arg5: memref<1x96xf32, #tpu.memory_space<vmem>>, %arg6: memref<16x96xf32, #tpu.memory_space<vmem>>, %arg7: memref<16x96xf32, #tpu.memory_space<vmem>>) attributes {dimension_semantics = [#tpu.dimension_semantics<parallel>, #tpu.dimension_semantics<parallel>, #tpu.dimension_semantics<arbitrary>], iteration_bounds = array<i64: 1, 1, 1>, scalar_prefetch = 0 : i64, scratch_operands = 1 : i64, tpu.core_type = #tpu.core_type<tc>, window_params = [{transform_indices = @transform_0, window_bounds = array<i64: 16, 32>}, {transform_indices = @transform_1, window_bounds = array<i64: 32, 96>}, {transform_indices = @transform_2, window_bounds = array<i64: 1, 96>}, {transform_indices = @transform_3, window_bounds = array<i64: 16, 96>}]} {
    %c0_i32 = arith.constant 0 : i32
    %0 = arith.cmpi eq, %arg2, %c0_i32 : i32
    %1 = arith.extui %0 : i1 to i32
    %c0_i32_0 = arith.constant 0 : i32
    %2 = arith.cmpi ne, %1, %c0_i32_0 : i32
    scf.if %2 {
      %cst_10 = arith.constant 0.000000e+00 : f32
      %14 = vector.broadcast %cst_10 : f32 to vector<16x96xf32>
      %c0_11 = arith.constant 0 : index
      %c0_12 = arith.constant 0 : index
      %15 = vector.load %arg7[%c0_11, %c0_12] : memref<16x96xf32, #tpu.memory_space<vmem>>, vector<16x96xf32>
      tpu.vector_store %arg7[%c0_11, %c0_12], %14 {strides = array<i32>} : memref<16x96xf32, #tpu.memory_space<vmem>>, vector<16x96xf32>,
    } else {
    }
    %c0 = arith.constant 0 : index
    %c0_1 = arith.constant 0 : index
    %3 = vector.load %arg7[%c0, %c0_1] : memref<16x96xf32, #tpu.memory_space<vmem>>, vector<16x96xf32>
    %c0_2 = arith.constant 0 : index
    %c0_3 = arith.constant 0 : index
    %4 = vector.load %arg3[%c0_2, %c0_3] : memref<16x32xf32, #tpu.memory_space<vmem>>, vector<16x32xf32>
    %5 = arith.truncf %4 : vector<16x32xf32> to vector<16x32xbf16>
    %c0_4 = arith.constant 0 : index
    %c0_5 = arith.constant 0 : index
    %6 = vector.load %arg4[%c0_4, %c0_5] : memref<32x96xf32, #tpu.memory_space<vmem>>, vector<32x96xf32>
    %7 = arith.truncf %6 : vector<32x96xf32> to vector<32x96xbf16>
    %cst = arith.constant dense<0.000000e+00> : vector<16x96xf32>
    %8 = tpu.matmul %5, %7, %cst {dimension_numbers = #tpu.dot_dimension_numbers<[1], [0], [0], [1], [0, 0, 1, 1], [], []>} : vector<16x32xbf16>, vector<32x96xbf16>, vector<16x96xf32> -> vector<16x96xf32>
    %9 = arith.addf %3, %8 : vector<16x96xf32>
    %c0_6 = arith.constant 0 : index
    %c0_7 = arith.constant 0 : index
    %10 = vector.load %arg7[%c0_6, %c0_7] : memref<16x96xf32, #tpu.memory_space<vmem>>, vector<16x96xf32>
    tpu.vector_store %arg7[%c0_6, %c0_7], %9 {strides = array<i32>} : memref<16x96xf32, #tpu.memory_space<vmem>>, vector<16x96xf32>,
    %c0_i32_8 = arith.constant 0 : i32
    %11 = arith.cmpi eq, %arg2, %c0_i32_8 : i32
    %12 = arith.extui %11 : i1 to i32
    %c0_i32_9 = arith.constant 0 : i32
    %13 = arith.cmpi ne, %12, %c0_i32_9 : i32
    scf.if %13 {
      %c0_10 = arith.constant 0 : index
      %c0_11 = arith.constant 0 : index
      %14 = vector.load %arg7[%c0_10, %c0_11] : memref<16x96xf32, #tpu.memory_space<vmem>>, vector<16x96xf32>
      %c0_12 = arith.constant 0 : index
      %c0_13 = arith.constant 0 : index
      %15 = vector.load %arg5[%c0_12, %c0_13] : memref<1x96xf32, #tpu.memory_space<vmem>>, vector<1x96xf32>
      %16 = vector.broadcast %15 : vector<1x96xf32> to vector<16x96xf32>
      %17 = arith.addf %14, %16 : vector<16x96xf32>
      %c0_14 = arith.constant 0 : index
      %c0_15 = arith.constant 0 : index
      %18 = vector.load %arg6[%c0_14, %c0_15] : memref<16x96xf32, #tpu.memory_space<vmem>>, vector<16x96xf32>
      tpu.vector_store %arg6[%c0_14, %c0_15], %17 {strides = array<i32>} : memref<16x96xf32, #tpu.memory_space<vmem>>, vector<16x96xf32>,
    } else {
    }
    return
  }
  func.func @transform_0(%arg0: i32, %arg1: i32, %arg2: i32) -> (i32, i32) {
    %c0_i32 = arith.constant 0 : i32
    return %arg0, %arg2 : i32, i32
  }
  func.func @transform_1(%arg0: i32, %arg1: i32, %arg2: i32) -> (i32, i32) {
    %c0_i32 = arith.constant 0 : i32
    return %arg2, %arg1 : i32, i32
  }
  func.func @transform_2(%arg0: i32, %arg1: i32, %arg2: i32) -> (i32, i32) {
    %c0_i32 = arith.constant 0 : i32
    %c0_i32_0 = arith.constant 0 : i32
    return %c0_i32, %arg1 : i32, i32
  }
  func.func @transform_3(%arg0: i32, %arg1: i32, %arg2: i32) -> (i32, i32) {
    %c0_i32 = arith.constant 0 : i32
    return %arg0, %arg1 : i32, i32
  }
}

</mosaic_0001>

<bundles_post_ra>
// kernel: tpu_custom_call.1
= control target key start
LH: loop header
LB: loop body
LE: loop exit
PB: predicated region body
PF: predicated region fallthrough
CT: control target
= control target key end

     0   :  { %8 = vsyncpa [#allocation4], 0  ;;  %s319_s0 = inlined_call_operand.hbm [shape: f32[16,32], index: 0, kind: input, shape index: {}]   ;;  %s320_s1 = inlined_call_operand.hbm [shape: f32[32,96], index: 1, kind: input, shape index: {}]   ;;  %s321_s2 = inlined_call_operand.vmem [shape: f32[1,96], index: 2, kind: input, shape index: {}]   ;;  %s322_s3 = inlined_call_operand.hbm [shape: f32[16,96], index: 3, kind: output, shape index: {}]  }
   0x1   :  { %9 = vsyncpa [#allocation7], 0 }
   0x2   :  { %10 = vsyncpa [#allocation5], 0  ;;  %s238_s12 = smov [#allocation3]   ;;  %s166_s16 = scalar_lea.hbm %s319_s0, 256 }
   0x3   :  { %s16_s13 = sshll.u32 %s238_s12, 4  ;;  %p167_p0 = scmp.ne.s32.totalorder %s319_s0, %s166_s16  ;;  %s17_s13 = int_to_ptr.vmem [resolvable:$true] %s16_s13 }
   0x4   :  { %p170_p1 = scmp.lt.u32.totalorder %s166_s16, %s319_s0 }
   0x6   :  { %p172_p2 = pnand %p170_p1, %p167_p0 }
   0x8   :  { %175 = shalt.err (!%p172_p2)
}
   0x9   :  { %s176_s21 = scalar_lea.vmem %s17_s13, 256  ;;  %p181_p4 = scmp.lt.s32.totalorder %s17_s13, %s17_s13 }
   0xa   :  { %p177_p3 = scmp.ne.s32.totalorder %s17_s13, %s176_s21  ;;  %p182_p5 = scmp.lt.s32.totalorder %s176_s21, %s176_s21 }
   0xc   :  { %p183_p6 = por %p182_p5, %p181_p4 }
   0xe   :  { %p184_p7 = pnand %p183_p6, %p177_p3 }
  0x10   :  { %187 = shalt.err (!%p184_p7)
}
  0x11   :  { %s239_s22 = smov 128   ;;  %s240_s23 = smov 8  }
  0x12   :  { %22 = dma.hbm_to_vmem [thread:$0]  %s319_s0, 256, %s17_s13, [#allocation4], %s239_s22, %s239_s22, %s240_s23  }
  0x13   :  { %s241_s26 = smov [#allocation6]   ;;  %s188_s30 = scalar_lea.hbm %s320_s1, 512 }
  0x14   :  { %s28_s27 = sshll.u32 %s241_s26, 4  ;;  %p189_p8 = scmp.ne.s32.totalorder %s320_s1, %s188_s30  ;;  %s29_s27 = int_to_ptr.vmem [resolvable:$true] %s28_s27 }
  0x15   :  { %p192_p9 = scmp.lt.u32.totalorder %s188_s30, %s320_s1 }
  0x17   :  { %p194_p10 = pnand %p192_p9, %p189_p8 }
  0x19   :  { %197 = shalt.err (!%p194_p10)
}
  0x1a   :  { %s198_s8 = scalar_lea.vmem %s29_s27, 512  ;;  %p203_p12 = scmp.lt.s32.totalorder %s29_s27, %s29_s27 }
  0x1b   :  { %p199_p11 = scmp.ne.s32.totalorder %s29_s27, %s198_s8  ;;  %p204_p13 = scmp.lt.s32.totalorder %s198_s8, %s198_s8 }
  0x1d   :  { %p205_p0 = por %p204_p13, %p203_p12 }
  0x1f   :  { %p206_p1 = pnand %p205_p0, %p199_p11 }
  0x21   :  { %209 = shalt.err (!%p206_p1)
}
  0x22   :  { %34 = dma.hbm_to_vmem [thread:$0]  %s320_s1, 512, %s29_s27, [#allocation7], %s239_s22, %s239_s22, %s240_s23  }
  0x23   :  { %232 = dma.done.wait [#allocation4], 256  }
  0x24   :  { %233 = vsyncadd [#allocation4], 4294967040 }
  0x25   :  { %234 = dma.done.wait [#allocation7], 512  }
  0x26   :  { %235 = vsyncadd [#allocation7], 4294966784  ;;  %vm48_vm0 = vcmask 785408   ;;  %v242_v0 = vmov 0.0   ;;  %vm243_vm1 = vmmov 0   ;;  %v56_v1 = vld [vmem:[#allocation6] sm:$0xff] }
  0x27   :  { %49 = vst.msk [vmem:[#allocation2] sm:$0xff] %vm48_vm0, %v242_v0  ;;  %50 = vst.msk [vmem:[#allocation2 + $0x8] sm:$0xff] %vm48_vm0, %v242_v0  ;;  %151 = vmatprep.subr.bf16.mxu0 %v242_v0  ;;  %155 = vmatprep.mubr.msk.bf16.mxu0 %vm243_vm1, %v242_v0  ;;  %v57_v2 = vld [vmem:[#allocation6 + $0x8] sm:$0xff]  ;;  %v58_v3 = vld [vmem:[#allocation6 + $0x10] sm:$0xff]  ;;  %vm62_vm2 = vcmask 261120   ;;  %s244_s11 = smov [#allocation8]  }
  0x28   :  { %v60_v4 = vpack.c.bf16 %v57_v2, %v56_v1  ;;  %v59_v5 = vld [vmem:[#allocation6 + $0x18] sm:$0xff]  ;;  %v53_v7 = vld [vmem:[#allocation3] sm:$0xff]  ;;  %v147_v18 = vld [vmem:[%s321_s2] ss:$0 sm:$0xff]  ;;  %s133_s12 = sshll.u32 %s244_s11, 4  ;;  %s134_s12 = int_to_ptr.vmem [resolvable:$true] %s133_s12 }
  0x29   :  { %v61_v6 = vpack.c.bf16 %v59_v5, %v58_v3  ;;  %v54_v8 = vld [vmem:[#allocation3 + $0x8] sm:$0xff]  ;;  %s210_s13 = scalar_lea.vmem %s134_s12, 256  ;;  %p215_p3 = scmp.lt.s32.totalorder %s134_s12, %s134_s12 }
  0x2a   :  { %152 = vmatpush3.bf16.msra.mxu0 %v60_v4  ;;  %v55_v9 = vpack.c.bf16 %v54_v8, %v53_v7  ;;  %p211_p2 = scmp.ne.s32.totalorder %s134_s12, %s210_s13  ;;  %p216_p4 = scmp.lt.s32.totalorder %s210_s13, %s210_s13 }
  0x2b   :  { %153 = vmatprep.subr.bf16.mxu0 %v242_v0 }
  0x2c   :  { %p217_p5 = por %p216_p4, %p215_p3 }
  0x2e   :  { %154 = vmatpush3.bf16.msra.mxu0 %v61_v6  ;;  %v51_v10 = vld [vmem:[#allocation2] sm:$0xff]  ;;  %v52_v12 = vld [vmem:[#allocation2 + $0x8] sm:$0xff]  ;;  %p218_p6 = pnand %p217_p5, %p211_p2 }
  0x31   :  { %156 = vmatmul.mubr.msk.bf16.vlgmr.msra.gmra.mrb[0].mxu0 %vm62_vm2, %v55_v9 }
 0x104   :  { %v100_v11 = vpop.f32.mrb[0].mxu0 }
 0x105   :  { %v107_v13 = vadd.f32 %v100_v11, %v51_v10  ;;  %v157_v14 = vpop.f32.mrb[1].mxu0 }
 0x106   :  { %v103_v15 = vpop.f32.mrb[2].mxu0 }
 0x107   :  { %110 = vst.msk [vmem:[#allocation2] sm:$0xff] %vm48_vm0, %v107_v13  ;;  %v108_v16 = vadd.f32 %v103_v15, %v52_v12  ;;  %v158_v17 = vpop.f32.mrb[3].mxu0 }
 0x109   :  { %111 = vst.msk [vmem:[#allocation2 + $0x8] sm:$0xff] %vm48_vm0, %v108_v16 }
 0x10e   :  { %v115_v19 = vld [vmem:[#allocation2] sm:$0xff] }
 0x10f   :  { %v124_v20 = vadd.f32 %v147_v18, %v115_v19 }
 0x110   :  { %v116_v21 = vld [vmem:[#allocation2 + $0x8] sm:$0xff] }
 0x111   :  { %v125_v22 = vadd.f32 %v147_v18, %v116_v21  ;;  %126 = vst.msk [vmem:[#allocation8] sm:$0xff] %vm48_vm0, %v124_v20 }
 0x113   :  { %127 = vst.msk [vmem:[#allocation8 + $0x8] sm:$0xff] %vm48_vm0, %v125_v22 }
 0x114   :  { %221 = shalt.err (!%p218_p6)
}
 0x115   :  { %s222_s15 = scalar_lea.hbm %s322_s3, 256 }
 0x116   :  { %p223_p7 = scmp.ne.s32.totalorder %s322_s3, %s222_s15  ;;  %p226_p8 = scmp.lt.u32.totalorder %s222_s15, %s322_s3 }
 0x118   :  { %p228_p9 = pnand %p226_p8, %p223_p7 }
 0x11a   :  { %231 = shalt.err (!%p228_p9)
}
 0x11b   :  { %139 = dma.vmem_to_hbm [thread:$0]  %s134_s12, 256, %s322_s3, [#allocation5], %s239_s22, %s239_s22, %s240_s23  }
 0x11c   :  { %236 = dma.done.wait [#allocation5], 256  }
 0x11d   :  { %237 = vsyncadd [#allocation5], 4294967040 }
 0x11e   :  { %143 = vsyncpa [#allocation4], 1 }
 0x11f   :  { %144 = vsyncpa [#allocation7], 1 }
 0x120   :  { %145 = vsyncpa [#allocation5], 1 }

</bundles_post_ra>
